<compile_context>
chip_gen: v7x
topology: tpu7x:2x2x1
jax: 0.10.0
libtpu: 0.0.40
codegen_flags: <defaults>
</compile_context>

<pallas_src>
import math

import jax
import jax.numpy as jnp
import numpy as np
from jax.experimental import pallas as pl
from jax.experimental.pallas import tpu as pltpu

# ---------------- config (small, consistent with the module) ----------------
B = 2          # batch
S = 8          # sequence length
H = 32         # hidden_size
NH = 4         # num_attention_heads
HD = H // NH   # attention_head_size
I = 64         # intermediate_size
LN_EPS = 1e-12


def _layer_norm(y, gamma, beta):
    # y: [R, H]; gamma/beta: [1, H].  Matches nn.LayerNorm (biased variance).
    mu = jnp.mean(y, axis=-1, keepdims=True)
    var = jnp.mean((y - mu) ** 2, axis=-1, keepdims=True)
    inv = jax.lax.rsqrt(var + LN_EPS)
    return (y - mu) * (inv * gamma) + beta


def _make_kernel(bb):
    """Build a kernel body that processes `bb` batch elements per grid step."""
    rows = bb * S

    def kernel(x_ref, mask_ref, wqkv_ref, bqkv_ref, wo_ref, wi_ref,
               wo2_ref, bi_ref, vec_ref, out_ref, ctx_ref):
        x = x_ref[...]                      # [rows, H] (bb batch elems stacked)
        bo = vec_ref[0:1, :]
        g1 = vec_ref[1:2, :]
        be1 = vec_ref[2:3, :]
        bo2 = vec_ref[3:4, :]
        g2 = vec_ref[4:5, :]
        be2 = vec_ref[5:6, :]

        # --- Fused Q/K/V projection: one MXU push -> [rows, 3H] ---
        qkv = jnp.dot(x, wqkv_ref[...],
                      preferred_element_type=jnp.float32) + bqkv_ref[...]
        q = qkv[:, 0:H] * (1.0 / math.sqrt(HD))   # pre-scaled once (hoisted)
        k = qkv[:, H:2 * H]
        v = qkv[:, 2 * H:3 * H]

        # --- Multi-head attention (static loops; heads write into scratch) ---
        for b_i in range(bb):
            r0 = b_i * S
            # Hoist the mask broadcast out of the head loop (JAX doesn't CSE).
            mask2d = jnp.broadcast_to(mask_ref[b_i], (S, S))   # [1,S] -> [S,S]
            for h in range(NH):
                c0 = h * HD
                qh = q[r0:r0 + S, c0:c0 + HD]
                kh = k[r0:r0 + S, c0:c0 + HD]
                vh = v[r0:r0 + S, c0:c0 + HD]
                scores = jnp.dot(qh, kh.T,
                                 preferred_element_type=jnp.float32) + mask2d
                m = jnp.max(scores, axis=-1, keepdims=True)
                e = jnp.exp(scores - m)
                inv_den = pl.reciprocal(jnp.sum(e, axis=-1, keepdims=True),
                                        approx=False)
                probs = e * inv_den
                # attention-probs dropout -> identity in eval mode
                ctx_ref[r0:r0 + S, c0:c0 + HD] = jnp.dot(
                    probs, vh, preferred_element_type=jnp.float32)

        ctx = ctx_ref[...]                  # [rows, H], no lane-concat needed

        # --- BertSelfOutput: dense + residual + LayerNorm ---
        attn = jnp.dot(ctx, wo_ref[...],
                       preferred_element_type=jnp.float32) + bo + x
        attn = _layer_norm(attn, g1, be1)

        # --- BertIntermediate: dense + ReLU ---
        inter = jnp.dot(attn, wi_ref[...],
                        preferred_element_type=jnp.float32) + bi_ref[...]
        inter = jnp.maximum(inter, 0.0)

        # --- BertOutput: dense + residual + LayerNorm ---
        out = jnp.dot(inter, wo2_ref[...],
                      preferred_element_type=jnp.float32) + bo2 + attn
        out_ref[...] = _layer_norm(out, g2, be2)

    return kernel


def _batch_block():
    """How many batch elements to process per grid step."""
    try:
        kind = jax.devices()[0].device_kind.lower()
    except Exception:
        kind = ""
    if "v7" in kind or "7x" in kind:
        # v7x: 2 TensorCores/chip -> keep a parallel grid over batch so each
        # TC takes one batch element.
        return 1
    # v5e/v6e: single TC -> grid steps are pure serial overhead; collapse.
    return B


def _const_spec(shape):
    n = len(shape)
    return pl.BlockSpec(shape, lambda b, n=n: (0,) * n)


def bert_layer(hidden_states, attention_mask, params):
    """hidden_states: [B,S,H], attention_mask: [B,1,S] additive mask."""
    (wq, bq, wk, bk, wv, bv, wo, bo, g1, be1,
     wi, bi, wo2, bo2, g2, be2) = params

    # Host-side packing: fuse QKV and stack the small [1,H] vectors so the
    # kernel sees 9 inputs instead of 18 (fewer DMA descriptors / buffers).
    wqkv = jnp.concatenate([wq, wk, wv], axis=1)                  # [H, 3H]
    bqkv = jnp.concatenate([bq, bk, bv], axis=1)                  # [1, 3H]
    vecs = jnp.concatenate([bo, g1, be1, bo2, g2, be2], axis=0)   # [6, H]

    x2 = hidden_states.reshape(B * S, H)    # lane-dense flat slab

    bb = _batch_block()
    rows = bb * S
    grid = (B // bb,)

    in_specs = [
        pl.BlockSpec((rows, H), lambda b: (b, 0)),        # hidden states
        pl.BlockSpec((bb, 1, S), lambda b: (b, 0, 0)),    # additive mask
        _const_spec((H, 3 * H)),                          # fused Wqkv
        _const_spec((1, 3 * H)),                          # fused bqkv
        _const_spec((H, H)),                              # Wo (self-output)
        _const_spec((H, I)),                              # Wi (intermediate)
        _const_spec((I, H)),                              # Wo2 (output)
        _const_spec((1, I)),                              # bi
        _const_spec((6, H)),                              # bo,g1,be1,bo2,g2,be2
    ]
    out_spec = pl.BlockSpec((rows, H), lambda b: (b, 0))

    fn = pl.pallas_call(
        _make_kernel(bb),
        out_shape=jax.ShapeDtypeStruct((B * S, H), jnp.float32),
        grid_spec=pltpu.PrefetchScalarGridSpec(
            num_scalar_prefetch=0,
            grid=grid,
            in_specs=in_specs,
            out_specs=out_spec,
            scratch_shapes=[pltpu.VMEM((rows, H), jnp.float32)],
        ),
        compiler_params=pltpu.CompilerParams(
            dimension_semantics=("parallel",)),
    )
    out = fn(x2, attention_mask, wqkv, bqkv, wo, wi, wo2, bi, vecs)
    return out.reshape(B, S, H)


# ------------------------- pure-JAX reference -------------------------------
def bert_layer_ref(x, mask, params):
    (wq, bq, wk, bk, wv, bv, wo, bo, g1, be1,
     wi, bi, wo2, bo2, g2, be2) = params

    def ln(y, g, b):
        mu = jnp.mean(y, axis=-1, keepdims=True)
        var = jnp.mean((y - mu) ** 2, axis=-1, keepdims=True)
        return (y - mu) * jax.lax.rsqrt(var + LN_EPS) * g + b

    q = x @ wq + bq
    k = x @ wk + bk
    v = x @ wv + bv
    q = q.reshape(B, S, NH, HD).transpose(0, 2, 1, 3)
    k = k.reshape(B, S, NH, HD).transpose(0, 2, 1, 3)
    v = v.reshape(B, S, NH, HD).transpose(0, 2, 1, 3)
    scores = jnp.einsum("bhqd,bhkd->bhqk", q, k) / math.sqrt(HD)
    scores = scores + mask[:, None, :, :]          # [B,1,1,S] broadcast
    probs = jax.nn.softmax(scores, axis=-1)
    ctx = jnp.einsum("bhqk,bhkd->bhqd", probs, v)
    ctx = ctx.transpose(0, 2, 1, 3).reshape(B, S, H)
    attn = ln(ctx @ wo + bo + x, g1, be1)
    inter = jax.nn.relu(attn @ wi + bi)
    return ln(inter @ wo2 + bo2 + attn, g2, be2)


def make_params(key):
    ks = jax.random.split(key, 10)
    std = 0.02
    wq = jax.random.normal(ks[0], (H, H), jnp.float32) * std
    wk = jax.random.normal(ks[1], (H, H), jnp.float32) * std
    wv = jax.random.normal(ks[2], (H, H), jnp.float32) * std
    wo = jax.random.normal(ks[3], (H, H), jnp.float32) * std
    wi = jax.random.normal(ks[4], (H, I), jnp.float32) * std
    wo2 = jax.random.normal(ks[5], (I, H), jnp.float32) * std
    bq = jax.random.normal(ks[6], (1, H), jnp.float32) * std
    bk = jax.random.normal(ks[7], (1, H), jnp.float32) * std
    bv = jax.random.normal(ks[8], (1, H), jnp.float32) * std
    bo = jnp.zeros((1, H), jnp.float32)
    bi = jnp.zeros((1, I), jnp.float32)
    bo2 = jnp.zeros((1, H), jnp.float32)
    g1 = jnp.ones((1, H), jnp.float32)
    be1 = jnp.zeros((1, H), jnp.float32)
    g2 = jnp.ones((1, H), jnp.float32)
    be2 = jnp.zeros((1, H), jnp.float32)
    return (wq, bq, wk, bk, wv, bv, wo, bo, g1, be1, wi, bi, wo2, bo2, g2, be2)


if __name__ == "__main__":
    key = jax.random.PRNGKey(0)
    k_x, k_p = jax.random.split(key)
    x = jax.random.normal(k_x, (B, S, H), jnp.float32)

    # Additive attention mask: last 2 key positions of batch 1 masked out.
    mask = np.zeros((B, 1, S), np.float32)
    mask[1, 0, -2:] = -1e9
    mask = jnp.asarray(mask)

    params = make_params(k_p)

    out = bert_layer(x, mask, params)
    out = jax.block_until_ready(out)

    ref = bert_layer_ref(x, mask, params)
    np.testing.assert_allclose(np.asarray(out), np.asarray(ref),
                               rtol=1e-4, atol=1e-5)

    print("KERNEL_OK")
</pallas_src>

<mosaic_0001>
module attributes {stable_mosaic.version = 11 : i64} {
  func.func @kernel(%arg0: i32, %arg1: memref<16x32xf32, #tpu.memory_space<vmem>>, %arg2: memref<2x1x8xf32, #tpu.memory_space<vmem>>, %arg3: memref<32x96xf32, #tpu.memory_space<vmem>>, %arg4: memref<1x96xf32, #tpu.memory_space<vmem>>, %arg5: memref<32x32xf32, #tpu.memory_space<vmem>>, %arg6: memref<32x64xf32, #tpu.memory_space<vmem>>, %arg7: memref<64x32xf32, #tpu.memory_space<vmem>>, %arg8: memref<1x64xf32, #tpu.memory_space<vmem>>, %arg9: memref<6x32xf32, #tpu.memory_space<vmem>>, %arg10: memref<16x32xf32, #tpu.memory_space<vmem>>, %arg11: memref<16x32xf32, #tpu.memory_space<vmem>>) attributes {dimension_semantics = [#tpu.dimension_semantics<parallel>], iteration_bounds = array<i64: 1>, scalar_prefetch = 0 : i64, scratch_operands = 1 : i64, tpu.core_type = #tpu.core_type<tc>, window_params = [{transform_indices = @transform_0, window_bounds = array<i64: 16, 32>}, {transform_indices = @transform_1, window_bounds = array<i64: 2, 1, 8>}, {pipeline_mode = #tpu.pipeline_mode<synchronous>, transform_indices = @transform_2, window_bounds = array<i64: 32, 96>}, {pipeline_mode = #tpu.pipeline_mode<synchronous>, transform_indices = @transform_3, window_bounds = array<i64: 1, 96>}, {pipeline_mode = #tpu.pipeline_mode<synchronous>, transform_indices = @transform_4, window_bounds = array<i64: 32, 32>}, {pipeline_mode = #tpu.pipeline_mode<synchronous>, transform_indices = @transform_5, window_bounds = array<i64: 32, 64>}, {pipeline_mode = #tpu.pipeline_mode<synchronous>, transform_indices = @transform_6, window_bounds = array<i64: 64, 32>}, {pipeline_mode = #tpu.pipeline_mode<synchronous>, transform_indices = @transform_7, window_bounds = array<i64: 1, 64>}, {pipeline_mode = #tpu.pipeline_mode<synchronous>, transform_indices = @transform_8, window_bounds = array<i64: 6, 32>}, {transform_indices = @transform_9, window_bounds = array<i64: 16, 32>}]} {
    %c0 = arith.constant 0 : index
    %c0_0 = arith.constant 0 : index
    %0 = vector.load %arg1[%c0, %c0_0] : memref<16x32xf32, #tpu.memory_space<vmem>>, vector<16x32xf32>
    %c0_1 = arith.constant 0 : index
    %c0_2 = arith.constant 0 : index
    %1 = vector.load %arg9[%c0_1, %c0_2] : memref<6x32xf32, #tpu.memory_space<vmem>>, vector<1x32xf32>
    %c1 = arith.constant 1 : index
    %c0_3 = arith.constant 0 : index
    %2 = vector.load %arg9[%c1, %c0_3] : memref<6x32xf32, #tpu.memory_space<vmem>>, vector<1x32xf32>
    %c2 = arith.constant 2 : index
    %c0_4 = arith.constant 0 : index
    %3 = vector.load %arg9[%c2, %c0_4] : memref<6x32xf32, #tpu.memory_space<vmem>>, vector<1x32xf32>
    %c3 = arith.constant 3 : index
    %c0_5 = arith.constant 0 : index
    %4 = vector.load %arg9[%c3, %c0_5] : memref<6x32xf32, #tpu.memory_space<vmem>>, vector<1x32xf32>
    %c4 = arith.constant 4 : index
    %c0_6 = arith.constant 0 : index
    %5 = vector.load %arg9[%c4, %c0_6] : memref<6x32xf32, #tpu.memory_space<vmem>>, vector<1x32xf32>
    %c5 = arith.constant 5 : index
    %c0_7 = arith.constant 0 : index
    %6 = vector.load %arg9[%c5, %c0_7] : memref<6x32xf32, #tpu.memory_space<vmem>>, vector<1x32xf32>
    %c0_8 = arith.constant 0 : index
    %c0_9 = arith.constant 0 : index
    %7 = vector.load %arg3[%c0_8, %c0_9] : memref<32x96xf32, #tpu.memory_space<vmem>>, vector<32x96xf32>
    %cst = arith.constant dense<0.000000e+00> : vector<16x96xf32>
    %8 = tpu.matmul %0, %7, %cst {dimension_numbers = #tpu.dot_dimension_numbers<[1], [0], [0], [1], [0, 0, 1, 1], [], []>} : vector<16x32xf32>, vector<32x96xf32>, vector<16x96xf32> -> vector<16x96xf32>
    %c0_10 = arith.constant 0 : index
    %c0_11 = arith.constant 0 : index
    %9 = vector.load %arg4[%c0_10, %c0_11] : memref<1x96xf32, #tpu.memory_space<vmem>>, vector<1x96xf32>
    %10 = vector.broadcast %9 : vector<1x96xf32> to vector<16x96xf32>
    %11 = arith.addf %8, %10 : vector<16x96xf32>
    %12 = vector.extract_strided_slice %11 {offsets = [0, 0], sizes = [16, 32], strides = [1, 1]} : vector<16x96xf32> to vector<16x32xf32>
    %cst_12 = arith.constant 0.353553385 : f32
    %13 = vector.broadcast %cst_12 : f32 to vector<16x32xf32>
    %14 = arith.mulf %12, %13 : vector<16x32xf32>
    %15 = vector.extract_strided_slice %11 {offsets = [0, 32], sizes = [16, 32], strides = [1, 1]} : vector<16x96xf32> to vector<16x32xf32>
    %16 = vector.extract_strided_slice %11 {offsets = [0, 64], sizes = [16, 32], strides = [1, 1]} : vector<16x96xf32> to vector<16x32xf32>
    %c0_13 = arith.constant 0 : index
    %c0_14 = arith.constant 0 : index
    %c0_15 = arith.constant 0 : index
    %17 = vector.load %arg2[%c0_13, %c0_14, %c0_15] : memref<2x1x8xf32, #tpu.memory_space<vmem>>, vector<1x1x8xf32>
    %18 = vector.shape_cast %17 : vector<1x1x8xf32> to vector<1x8xf32>
    %19 = vector.shape_cast %18 : vector<1x8xf32> to vector<1x8xf32>
    %20 = vector.broadcast %19 : vector<1x8xf32> to vector<8x8xf32>
    %21 = vector.extract_strided_slice %14 {offsets = [0, 0], sizes = [8, 8], strides = [1, 1]} : vector<16x32xf32> to vector<8x8xf32>
    %22 = vector.extract_strided_slice %15 {offsets = [0, 0], sizes = [8, 8], strides = [1, 1]} : vector<16x32xf32> to vector<8x8xf32>
    %23 = vector.extract_strided_slice %16 {offsets = [0, 0], sizes = [8, 8], strides = [1, 1]} : vector<16x32xf32> to vector<8x8xf32>
    %24 = tpu.transpose %22, [1, 0] : vector<8x8xf32> -> vector<8x8xf32>
    %cst_16 = arith.constant dense<0.000000e+00> : vector<8x8xf32>
    %25 = tpu.matmul %21, %24, %cst_16 {dimension_numbers = #tpu.dot_dimension_numbers<[1], [0], [0], [1], [0, 0, 1, 1], [], []>} : vector<8x8xf32>, vector<8x8xf32>, vector<8x8xf32> -> vector<8x8xf32>
    %26 = arith.addf %25, %20 : vector<8x8xf32>
    %cst_17 = arith.constant dense<0xFF800000> : vector<8xf32>
    %27 = vector.multi_reduction <maximumf>, %26, %cst_17 [1] : vector<8x8xf32> to vector<8xf32>
    %28 = vector.shape_cast %27 : vector<8xf32> to vector<8x1xf32>
    %29 = vector.broadcast %28 : vector<8x1xf32> to vector<8x8xf32>
    %30 = arith.subf %26, %29 : vector<8x8xf32>
    %31 = math.exp %30 : vector<8x8xf32>
    %cst_18 = arith.constant dense<0.000000e+00> : vector<8xf32>
    %32 = vector.multi_reduction <add>, %31, %cst_18 [1] : vector<8x8xf32> to vector<8xf32>
    %33 = vector.shape_cast %32 : vector<8xf32> to vector<8x1xf32>
    %34 = tpu.reciprocal %33 : vector<8x1xf32> -> vector<8x1xf32>
    %35 = vector.broadcast %34 : vector<8x1xf32> to vector<8x8xf32>
    %36 = arith.mulf %31, %35 : vector<8x8xf32>
    %cst_19 = arith.constant dense<0.000000e+00> : vector<8x8xf32>
    %37 = tpu.matmul %36, %23, %cst_19 {dimension_numbers = #tpu.dot_dimension_numbers<[1], [0], [0], [1], [0, 0, 1, 1], [], []>} : vector<8x8xf32>, vector<8x8xf32>, vector<8x8xf32> -> vector<8x8xf32>
    %c0_20 = arith.constant 0 : index
    %c0_21 = arith.constant 0 : index
    %38 = vector.load %arg11[%c0_20, %c0_21] : memref<16x32xf32, #tpu.memory_space<vmem>>, vector<8x8xf32>
    tpu.vector_store %arg11[%c0_20, %c0_21], %37 {strides = array<i32>} : memref<16x32xf32, #tpu.memory_space<vmem>>, vector<8x8xf32>,
    %39 = vector.extract_strided_slice %14 {offsets = [0, 8], sizes = [8, 8], strides = [1, 1]} : vector<16x32xf32> to vector<8x8xf32>
    %40 = vector.extract_strided_slice %15 {offsets = [0, 8], sizes = [8, 8], strides = [1, 1]} : vector<16x32xf32> to vector<8x8xf32>
    %41 = vector.extract_strided_slice %16 {offsets = [0, 8], sizes = [8, 8], strides = [1, 1]} : vector<16x32xf32> to vector<8x8xf32>
    %42 = tpu.transpose %40, [1, 0] : vector<8x8xf32> -> vector<8x8xf32>
    %cst_22 = arith.constant dense<0.000000e+00> : vector<8x8xf32>
    %43 = tpu.matmul %39, %42, %cst_22 {dimension_numbers = #tpu.dot_dimension_numbers<[1], [0], [0], [1], [0, 0, 1, 1], [], []>} : vector<8x8xf32>, vector<8x8xf32>, vector<8x8xf32> -> vector<8x8xf32>
    %44 = arith.addf %43, %20 : vector<8x8xf32>
    %cst_23 = arith.constant dense<0xFF800000> : vector<8xf32>
    %45 = vector.multi_reduction <maximumf>, %44, %cst_23 [1] : vector<8x8xf32> to vector<8xf32>
    %46 = vector.shape_cast %45 : vector<8xf32> to vector<8x1xf32>
    %47 = vector.broadcast %46 : vector<8x1xf32> to vector<8x8xf32>
    %48 = arith.subf %44, %47 : vector<8x8xf32>
    %49 = math.exp %48 : vector<8x8xf32>
    %cst_24 = arith.constant dense<0.000000e+00> : vector<8xf32>
    %50 = vector.multi_reduction <add>, %49, %cst_24 [1] : vector<8x8xf32> to vector<8xf32>
    %51 = vector.shape_cast %50 : vector<8xf32> to vector<8x1xf32>
    %52 = tpu.reciprocal %51 : vector<8x1xf32> -> vector<8x1xf32>
    %53 = vector.broadcast %52 : vector<8x1xf32> to vector<8x8xf32>
    %54 = arith.mulf %49, %53 : vector<8x8xf32>
    %cst_25 = arith.constant dense<0.000000e+00> : vector<8x8xf32>
    %55 = tpu.matmul %54, %41, %cst_25 {dimension_numbers = #tpu.dot_dimension_numbers<[1], [0], [0], [1], [0, 0, 1, 1], [], []>} : vector<8x8xf32>, vector<8x8xf32>, vector<8x8xf32> -> vector<8x8xf32>
    %c0_26 = arith.constant 0 : index
    %c8 = arith.constant 8 : index
    %56 = vector.load %arg11[%c0_26, %c8] : memref<16x32xf32, #tpu.memory_space<vmem>>, vector<8x8xf32>
    tpu.vector_store %arg11[%c0_26, %c8], %55 {strides = array<i32>} : memref<16x32xf32, #tpu.memory_space<vmem>>, vector<8x8xf32>,
    %57 = vector.extract_strided_slice %14 {offsets = [0, 16], sizes = [8, 8], strides = [1, 1]} : vector<16x32xf32> to vector<8x8xf32>
    %58 = vector.extract_strided_slice %15 {offsets = [0, 16], sizes = [8, 8], strides = [1, 1]} : vector<16x32xf32> to vector<8x8xf32>
    %59 = vector.extract_strided_slice %16 {offsets = [0, 16], sizes = [8, 8], strides = [1, 1]} : vector<16x32xf32> to vector<8x8xf32>
    %60 = tpu.transpose %58, [1, 0] : vector<8x8xf32> -> vector<8x8xf32>
    %cst_27 = arith.constant dense<0.000000e+00> : vector<8x8xf32>
    %61 = tpu.matmul %57, %60, %cst_27 {dimension_numbers = #tpu.dot_dimension_numbers<[1], [0], [0], [1], [0, 0, 1, 1], [], []>} : vector<8x8xf32>, vector<8x8xf32>, vector<8x8xf32> -> vector<8x8xf32>
    %62 = arith.addf %61, %20 : vector<8x8xf32>
    %cst_28 = arith.constant dense<0xFF800000> : vector<8xf32>
    %63 = vector.multi_reduction <maximumf>, %62, %cst_28 [1] : vector<8x8xf32> to vector<8xf32>
    %64 = vector.shape_cast %63 : vector<8xf32> to vector<8x1xf32>
    %65 = vector.broadcast %64 : vector<8x1xf32> to vector<8x8xf32>
    %66 = arith.subf %62, %65 : vector<8x8xf32>
    %67 = math.exp %66 : vector<8x8xf32>
    %cst_29 = arith.constant dense<0.000000e+00> : vector<8xf32>
    %68 = vector.multi_reduction <add>, %67, %cst_29 [1] : vector<8x8xf32> to vector<8xf32>
    %69 = vector.shape_cast %68 : vector<8xf32> to vector<8x1xf32>
    %70 = tpu.reciprocal %69 : vector<8x1xf32> -> vector<8x1xf32>
    %71 = vector.broadcast %70 : vector<8x1xf32> to vector<8x8xf32>
    %72 = arith.mulf %67, %71 : vector<8x8xf32>
    %cst_30 = arith.constant dense<0.000000e+00> : vector<8x8xf32>
    %73 = tpu.matmul %72, %59, %cst_30 {dimension_numbers = #tpu.dot_dimension_numbers<[1], [0], [0], [1], [0, 0, 1, 1], [], []>} : vector<8x8xf32>, vector<8x8xf32>, vector<8x8xf32> -> vector<8x8xf32>
    %c0_31 = arith.constant 0 : index
    %c16 = arith.constant 16 : index
    %74 = vector.load %arg11[%c0_31, %c16] : memref<16x32xf32, #tpu.memory_space<vmem>>, vector<8x8xf32>
    tpu.vector_store %arg11[%c0_31, %c16], %73 {strides = array<i32>} : memref<16x32xf32, #tpu.memory_space<vmem>>, vector<8x8xf32>,
    %75 = vector.extract_strided_slice %14 {offsets = [0, 24], sizes = [8, 8], strides = [1, 1]} : vector<16x32xf32> to vector<8x8xf32>
    %76 = vector.extract_strided_slice %15 {offsets = [0, 24], sizes = [8, 8], strides = [1, 1]} : vector<16x32xf32> to vector<8x8xf32>
    %77 = vector.extract_strided_slice %16 {offsets = [0, 24], sizes = [8, 8], strides = [1, 1]} : vector<16x32xf32> to vector<8x8xf32>
    %78 = tpu.transpose %76, [1, 0] : vector<8x8xf32> -> vector<8x8xf32>
    %cst_32 = arith.constant dense<0.000000e+00> : vector<8x8xf32>
    %79 = tpu.matmul %75, %78, %cst_32 {dimension_numbers = #tpu.dot_dimension_numbers<[1], [0], [0], [1], [0, 0, 1, 1], [], []>} : vector<8x8xf32>, vector<8x8xf32>, vector<8x8xf32> -> vector<8x8xf32>
    %80 = arith.addf %79, %20 : vector<8x8xf32>
    %cst_33 = arith.constant dense<0xFF800000> : vector<8xf32>
    %81 = vector.multi_reduction <maximumf>, %80, %cst_33 [1] : vector<8x8xf32> to vector<8xf32>
    %82 = vector.shape_cast %81 : vector<8xf32> to vector<8x1xf32>
    %83 = vector.broadcast %82 : vector<8x1xf32> to vector<8x8xf32>
    %84 = arith.subf %80, %83 : vector<8x8xf32>
    %85 = math.exp %84 : vector<8x8xf32>
    %cst_34 = arith.constant dense<0.000000e+00> : vector<8xf32>
    %86 = vector.multi_reduction <add>, %85, %cst_34 [1] : vector<8x8xf32> to vector<8xf32>
    %87 = vector.shape_cast %86 : vector<8xf32> to vector<8x1xf32>
    %88 = tpu.reciprocal %87 : vector<8x1xf32> -> vector<8x1xf32>
    %89 = vector.broadcast %88 : vector<8x1xf32> to vector<8x8xf32>
    %90 = arith.mulf %85, %89 : vector<8x8xf32>
    %cst_35 = arith.constant dense<0.000000e+00> : vector<8x8xf32>
    %91 = tpu.matmul %90, %77, %cst_35 {dimension_numbers = #tpu.dot_dimension_numbers<[1], [0], [0], [1], [0, 0, 1, 1], [], []>} : vector<8x8xf32>, vector<8x8xf32>, vector<8x8xf32> -> vector<8x8xf32>
    %c0_36 = arith.constant 0 : index
    %c24 = arith.constant 24 : index
    %92 = vector.load %arg11[%c0_36, %c24] : memref<16x32xf32, #tpu.memory_space<vmem>>, vector<8x8xf32>
    tpu.vector_store %arg11[%c0_36, %c24], %91 {strides = array<i32>} : memref<16x32xf32, #tpu.memory_space<vmem>>, vector<8x8xf32>,
    %c1_37 = arith.constant 1 : index
    %c0_38 = arith.constant 0 : index
    %c0_39 = arith.constant 0 : index
    %93 = vector.load %arg2[%c1_37, %c0_38, %c0_39] : memref<2x1x8xf32, #tpu.memory_space<vmem>>, vector<1x1x8xf32>
    %94 = vector.shape_cast %93 : vector<1x1x8xf32> to vector<1x8xf32>
    %95 = vector.shape_cast %94 : vector<1x8xf32> to vector<1x8xf32>
    %96 = vector.broadcast %95 : vector<1x8xf32> to vector<8x8xf32>
    %97 = vector.extract_strided_slice %14 {offsets = [8, 0], sizes = [8, 8], strides = [1, 1]} : vector<16x32xf32> to vector<8x8xf32>
    %98 = vector.extract_strided_slice %15 {offsets = [8, 0], sizes = [8, 8], strides = [1, 1]} : vector<16x32xf32> to vector<8x8xf32>
    %99 = vector.extract_strided_slice %16 {offsets = [8, 0], sizes = [8, 8], strides = [1, 1]} : vector<16x32xf32> to vector<8x8xf32>
    %100 = tpu.transpose %98, [1, 0] : vector<8x8xf32> -> vector<8x8xf32>
    %cst_40 = arith.constant dense<0.000000e+00> : vector<8x8xf32>
    %101 = tpu.matmul %97, %100, %cst_40 {dimension_numbers = #tpu.dot_dimension_numbers<[1], [0], [0], [1], [0, 0, 1, 1], [], []>} : vector<8x8xf32>, vector<8x8xf32>, vector<8x8xf32> -> vector<8x8xf32>
    %102 = arith.addf %101, %96 : vector<8x8xf32>
    %cst_41 = arith.constant dense<0xFF800000> : vector<8xf32>
    %103 = vector.multi_reduction <maximumf>, %102, %cst_41 [1] : vector<8x8xf32> to vector<8xf32>
    %104 = vector.shape_cast %103 : vector<8xf32> to vector<8x1xf32>
    %105 = vector.broadcast %104 : vector<8x1xf32> to vector<8x8xf32>
    %106 = arith.subf %102, %105 : vector<8x8xf32>
    %107 = math.exp %106 : vector<8x8xf32>
    %cst_42 = arith.constant dense<0.000000e+00> : vector<8xf32>
    %108 = vector.multi_reduction <add>, %107, %cst_42 [1] : vector<8x8xf32> to vector<8xf32>
    %109 = vector.shape_cast %108 : vector<8xf32> to vector<8x1xf32>
    %110 = tpu.reciprocal %109 : vector<8x1xf32> -> vector<8x1xf32>
    %111 = vector.broadcast %110 : vector<8x1xf32> to vector<8x8xf32>
    %112 = arith.mulf %107, %111 : vector<8x8xf32>
    %cst_43 = arith.constant dense<0.000000e+00> : vector<8x8xf32>
    %113 = tpu.matmul %112, %99, %cst_43 {dimension_numbers = #tpu.dot_dimension_numbers<[1], [0], [0], [1], [0, 0, 1, 1], [], []>} : vector<8x8xf32>, vector<8x8xf32>, vector<8x8xf32> -> vector<8x8xf32>
    %c8_44 = arith.constant 8 : index
    %c0_45 = arith.constant 0 : index
    %114 = vector.load %arg11[%c8_44, %c0_45] : memref<16x32xf32, #tpu.memory_space<vmem>>, vector<8x8xf32>
    tpu.vector_store %arg11[%c8_44, %c0_45], %113 {strides = array<i32>} : memref<16x32xf32, #tpu.memory_space<vmem>>, vector<8x8xf32>,
    %115 = vector.extract_strided_slice %14 {offsets = [8, 8], sizes = [8, 8], strides = [1, 1]} : vector<16x32xf32> to vector<8x8xf32>
    %116 = vector.extract_strided_slice %15 {offsets = [8, 8], sizes = [8, 8], strides = [1, 1]} : vector<16x32xf32> to vector<8x8xf32>
    %117 = vector.extract_strided_slice %16 {offsets = [8, 8], sizes = [8, 8], strides = [1, 1]} : vector<16x32xf32> to vector<8x8xf32>
    %118 = tpu.transpose %116, [1, 0] : vector<8x8xf32> -> vector<8x8xf32>
    %cst_46 = arith.constant dense<0.000000e+00> : vector<8x8xf32>
    %119 = tpu.matmul %115, %118, %cst_46 {dimension_numbers = #tpu.dot_dimension_numbers<[1], [0], [0], [1], [0, 0, 1, 1], [], []>} : vector<8x8xf32>, vector<8x8xf32>, vector<8x8xf32> -> vector<8x8xf32>
    %120 = arith.addf %119, %96 : vector<8x8xf32>
    %cst_47 = arith.constant dense<0xFF800000> : vector<8xf32>
    %121 = vector.multi_reduction <maximumf>, %120, %cst_47 [1] : vector<8x8xf32> to vector<8xf32>
    %122 = vector.shape_cast %121 : vector<8xf32> to vector<8x1xf32>
    %123 = vector.broadcast %122 : vector<8x1xf32> to vector<8x8xf32>
    %124 = arith.subf %120, %123 : vector<8x8xf32>
    %125 = math.exp %124 : vector<8x8xf32>
    %cst_48 = arith.constant dense<0.000000e+00> : vector<8xf32>
    %126 = vector.multi_reduction <add>, %125, %cst_48 [1] : vector<8x8xf32> to vector<8xf32>
    %127 = vector.shape_cast %126 : vector<8xf32> to vector<8x1xf32>
    %128 = tpu.reciprocal %127 : vector<8x1xf32> -> vector<8x1xf32>
    %129 = vector.broadcast %128 : vector<8x1xf32> to vector<8x8xf32>
    %130 = arith.mulf %125, %129 : vector<8x8xf32>
    %cst_49 = arith.constant dense<0.000000e+00> : vector<8x8xf32>
    %131 = tpu.matmul %130, %117, %cst_49 {dimension_numbers = #tpu.dot_dimension_numbers<[1], [0], [0], [1], [0, 0, 1, 1], [], []>} : vector<8x8xf32>, vector<8x8xf32>, vector<8x8xf32> -> vector<8x8xf32>
    %c8_50 = arith.constant 8 : index
    %c8_51 = arith.constant 8 : index
    %132 = vector.load %arg11[%c8_50, %c8_51] : memref<16x32xf32, #tpu.memory_space<vmem>>, vector<8x8xf32>
    tpu.vector_store %arg11[%c8_50, %c8_51], %131 {strides = array<i32>} : memref<16x32xf32, #tpu.memory_space<vmem>>, vector<8x8xf32>,
    %133 = vector.extract_strided_slice %14 {offsets = [8, 16], sizes = [8, 8], strides = [1, 1]} : vector<16x32xf32> to vector<8x8xf32>
    %134 = vector.extract_strided_slice %15 {offsets = [8, 16], sizes = [8, 8], strides = [1, 1]} : vector<16x32xf32> to vector<8x8xf32>
    %135 = vector.extract_strided_slice %16 {offsets = [8, 16], sizes = [8, 8], strides = [1, 1]} : vector<16x32xf32> to vector<8x8xf32>
    %136 = tpu.transpose %134, [1, 0] : vector<8x8xf32> -> vector<8x8xf32>
    %cst_52 = arith.constant dense<0.000000e+00> : vector<8x8xf32>
    %137 = tpu.matmul %133, %136, %cst_52 {dimension_numbers = #tpu.dot_dimension_numbers<[1], [0], [0], [1], [0, 0, 1, 1], [], []>} : vector<8x8xf32>, vector<8x8xf32>, vector<8x8xf32> -> vector<8x8xf32>
    %138 = arith.addf %137, %96 : vector<8x8xf32>
    %cst_53 = arith.constant dense<0xFF800000> : vector<8xf32>
    %139 = vector.multi_reduction <maximumf>, %138, %cst_53 [1] : vector<8x8xf32> to vector<8xf32>
    %140 = vector.shape_cast %139 : vector<8xf32> to vector<8x1xf32>
    %141 = vector.broadcast %140 : vector<8x1xf32> to vector<8x8xf32>
    %142 = arith.subf %138, %141 : vector<8x8xf32>
    %143 = math.exp %142 : vector<8x8xf32>
    %cst_54 = arith.constant dense<0.000000e+00> : vector<8xf32>
    %144 = vector.multi_reduction <add>, %143, %cst_54 [1] : vector<8x8xf32> to vector<8xf32>
    %145 = vector.shape_cast %144 : vector<8xf32> to vector<8x1xf32>
    %146 = tpu.reciprocal %145 : vector<8x1xf32> -> vector<8x1xf32>
    %147 = vector.broadcast %146 : vector<8x1xf32> to vector<8x8xf32>
    %148 = arith.mulf %143, %147 : vector<8x8xf32>
    %cst_55 = arith.constant dense<0.000000e+00> : vector<8x8xf32>
    %149 = tpu.matmul %148, %135, %cst_55 {dimension_numbers = #tpu.dot_dimension_numbers<[1], [0], [0], [1], [0, 0, 1, 1], [], []>} : vector<8x8xf32>, vector<8x8xf32>, vector<8x8xf32> -> vector<8x8xf32>
    %c8_56 = arith.constant 8 : index
    %c16_57 = arith.constant 16 : index
    %150 = vector.load %arg11[%c8_56, %c16_57] : memref<16x32xf32, #tpu.memory_space<vmem>>, vector<8x8xf32>
    tpu.vector_store %arg11[%c8_56, %c16_57], %149 {strides = array<i32>} : memref<16x32xf32, #tpu.memory_space<vmem>>, vector<8x8xf32>,
    %151 = vector.extract_strided_slice %14 {offsets = [8, 24], sizes = [8, 8], strides = [1, 1]} : vector<16x32xf32> to vector<8x8xf32>
    %152 = vector.extract_strided_slice %15 {offsets = [8, 24], sizes = [8, 8], strides = [1, 1]} : vector<16x32xf32> to vector<8x8xf32>
    %153 = vector.extract_strided_slice %16 {offsets = [8, 24], sizes = [8, 8], strides = [1, 1]} : vector<16x32xf32> to vector<8x8xf32>
    %154 = tpu.transpose %152, [1, 0] : vector<8x8xf32> -> vector<8x8xf32>
    %cst_58 = arith.constant dense<0.000000e+00> : vector<8x8xf32>
    %155 = tpu.matmul %151, %154, %cst_58 {dimension_numbers = #tpu.dot_dimension_numbers<[1], [0], [0], [1], [0, 0, 1, 1], [], []>} : vector<8x8xf32>, vector<8x8xf32>, vector<8x8xf32> -> vector<8x8xf32>
    %156 = arith.addf %155, %96 : vector<8x8xf32>
    %cst_59 = arith.constant dense<0xFF800000> : vector<8xf32>
    %157 = vector.multi_reduction <maximumf>, %156, %cst_59 [1] : vector<8x8xf32> to vector<8xf32>
    %158 = vector.shape_cast %157 : vector<8xf32> to vector<8x1xf32>
    %159 = vector.broadcast %158 : vector<8x1xf32> to vector<8x8xf32>
    %160 = arith.subf %156, %159 : vector<8x8xf32>
    %161 = math.exp %160 : vector<8x8xf32>
    %cst_60 = arith.constant dense<0.000000e+00> : vector<8xf32>
    %162 = vector.multi_reduction <add>, %161, %cst_60 [1] : vector<8x8xf32> to vector<8xf32>
    %163 = vector.shape_cast %162 : vector<8xf32> to vector<8x1xf32>
    %164 = tpu.reciprocal %163 : vector<8x1xf32> -> vector<8x1xf32>
    %165 = vector.broadcast %164 : vector<8x1xf32> to vector<8x8xf32>
    %166 = arith.mulf %161, %165 : vector<8x8xf32>
    %cst_61 = arith.constant dense<0.000000e+00> : vector<8x8xf32>
    %167 = tpu.matmul %166, %153, %cst_61 {dimension_numbers = #tpu.dot_dimension_numbers<[1], [0], [0], [1], [0, 0, 1, 1], [], []>} : vector<8x8xf32>, vector<8x8xf32>, vector<8x8xf32> -> vector<8x8xf32>
    %c8_62 = arith.constant 8 : index
    %c24_63 = arith.constant 24 : index
    %168 = vector.load %arg11[%c8_62, %c24_63] : memref<16x32xf32, #tpu.memory_space<vmem>>, vector<8x8xf32>
    tpu.vector_store %arg11[%c8_62, %c24_63], %167 {strides = array<i32>} : memref<16x32xf32, #tpu.memory_space<vmem>>, vector<8x8xf32>,
    %c0_64 = arith.constant 0 : index
    %c0_65 = arith.constant 0 : index
    %169 = vector.load %arg11[%c0_64, %c0_65] : memref<16x32xf32, #tpu.memory_space<vmem>>, vector<16x32xf32>
    %c0_66 = arith.constant 0 : index
    %c0_67 = arith.constant 0 : index
    %170 = vector.load %arg5[%c0_66, %c0_67] : memref<32x32xf32, #tpu.memory_space<vmem>>, vector<32x32xf32>
    %cst_68 = arith.constant dense<0.000000e+00> : vector<16x32xf32>
    %171 = tpu.matmul %169, %170, %cst_68 {dimension_numbers = #tpu.dot_dimension_numbers<[1], [0], [0], [1], [0, 0, 1, 1], [], []>} : vector<16x32xf32>, vector<32x32xf32>, vector<16x32xf32> -> vector<16x32xf32>
    %172 = vector.broadcast %1 : vector<1x32xf32> to vector<16x32xf32>
    %173 = arith.addf %171, %172 : vector<16x32xf32>
    %174 = arith.addf %173, %0 : vector<16x32xf32>
    %cst_69 = arith.constant dense<0.000000e+00> : vector<16xf32>
    %175 = vector.multi_reduction <add>, %174, %cst_69 [1] : vector<16x32xf32> to vector<16xf32>
    %176 = vector.shape_cast %175 : vector<16xf32> to vector<16x1xf32>
    %cst_70 = arith.constant 3.200000e+01 : f32
    %177 = vector.broadcast %cst_70 : f32 to vector<16x1xf32>
    %178 = arith.divf %176, %177 : vector<16x1xf32>
    %179 = vector.broadcast %178 : vector<16x1xf32> to vector<16x32xf32>
    %180 = arith.subf %174, %179 : vector<16x32xf32>
    %181 = arith.mulf %180, %180 : vector<16x32xf32>
    %cst_71 = arith.constant dense<0.000000e+00> : vector<16xf32>
    %182 = vector.multi_reduction <add>, %181, %cst_71 [1] : vector<16x32xf32> to vector<16xf32>
    %183 = vector.shape_cast %182 : vector<16xf32> to vector<16x1xf32>
    %cst_72 = arith.constant 3.200000e+01 : f32
    %184 = vector.broadcast %cst_72 : f32 to vector<16x1xf32>
    %185 = arith.divf %183, %184 : vector<16x1xf32>
    %cst_73 = arith.constant 9.99999996E-13 : f32
    %186 = vector.broadcast %cst_73 : f32 to vector<16x1xf32>
    %187 = arith.addf %185, %186 : vector<16x1xf32>
    %188 = math.rsqrt %187 : vector<16x1xf32>
    %189 = vector.broadcast %178 : vector<16x1xf32> to vector<16x32xf32>
    %190 = arith.subf %174, %189 : vector<16x32xf32>
    %191 = vector.broadcast %188 : vector<16x1xf32> to vector<16x32xf32>
    %192 = vector.broadcast %2 : vector<1x32xf32> to vector<16x32xf32>
    %193 = arith.mulf %191, %192 : vector<16x32xf32>
    %194 = arith.mulf %190, %193 : vector<16x32xf32>
    %195 = vector.broadcast %3 : vector<1x32xf32> to vector<16x32xf32>
    %196 = arith.addf %194, %195 : vector<16x32xf32>
    %c0_74 = arith.constant 0 : index
    %c0_75 = arith.constant 0 : index
    %197 = vector.load %arg6[%c0_74, %c0_75] : memref<32x64xf32, #tpu.memory_space<vmem>>, vector<32x64xf32>
    %cst_76 = arith.constant dense<0.000000e+00> : vector<16x64xf32>
    %198 = tpu.matmul %196, %197, %cst_76 {dimension_numbers = #tpu.dot_dimension_numbers<[1], [0], [0], [1], [0, 0, 1, 1], [], []>} : vector<16x32xf32>, vector<32x64xf32>, vector<16x64xf32> -> vector<16x64xf32>
    %c0_77 = arith.constant 0 : index
    %c0_78 = arith.constant 0 : index
    %199 = vector.load %arg8[%c0_77, %c0_78] : memref<1x64xf32, #tpu.memory_space<vmem>>, vector<1x64xf32>
    %200 = vector.broadcast %199 : vector<1x64xf32> to vector<16x64xf32>
    %201 = arith.addf %198, %200 : vector<16x64xf32>
    %cst_79 = arith.constant 0.000000e+00 : f32
    %202 = vector.broadcast %cst_79 : f32 to vector<16x64xf32>
    %203 = arith.maximumf %201, %202 : vector<16x64xf32>
    %c0_80 = arith.constant 0 : index
    %c0_81 = arith.constant 0 : index
    %204 = vector.load %arg7[%c0_80, %c0_81] : memref<64x32xf32, #tpu.memory_space<vmem>>, vector<64x32xf32>
    %cst_82 = arith.constant dense<0.000000e+00> : vector<16x32xf32>
    %205 = tpu.matmul %203, %204, %cst_82 {dimension_numbers = #tpu.dot_dimension_numbers<[1], [0], [0], [1], [0, 0, 1, 1], [], []>} : vector<16x64xf32>, vector<64x32xf32>, vector<16x32xf32> -> vector<16x32xf32>
    %206 = vector.broadcast %4 : vector<1x32xf32> to vector<16x32xf32>
    %207 = arith.addf %205, %206 : vector<16x32xf32>
    %208 = arith.addf %207, %196 : vector<16x32xf32>
    %cst_83 = arith.constant dense<0.000000e+00> : vector<16xf32>
    %209 = vector.multi_reduction <add>, %208, %cst_83 [1] : vector<16x32xf32> to vector<16xf32>
    %210 = vector.shape_cast %209 : vector<16xf32> to vector<16x1xf32>
    %cst_84 = arith.constant 3.200000e+01 : f32
    %211 = vector.broadcast %cst_84 : f32 to vector<16x1xf32>
    %212 = arith.divf %210, %211 : vector<16x1xf32>
    %213 = vector.broadcast %212 : vector<16x1xf32> to vector<16x32xf32>
    %214 = arith.subf %208, %213 : vector<16x32xf32>
    %215 = arith.mulf %214, %214 : vector<16x32xf32>
    %cst_85 = arith.constant dense<0.000000e+00> : vector<16xf32>
    %216 = vector.multi_reduction <add>, %215, %cst_85 [1] : vector<16x32xf32> to vector<16xf32>
    %217 = vector.shape_cast %216 : vector<16xf32> to vector<16x1xf32>
    %cst_86 = arith.constant 3.200000e+01 : f32
    %218 = vector.broadcast %cst_86 : f32 to vector<16x1xf32>
    %219 = arith.divf %217, %218 : vector<16x1xf32>
    %cst_87 = arith.constant 9.99999996E-13 : f32
    %220 = vector.broadcast %cst_87 : f32 to vector<16x1xf32>
    %221 = arith.addf %219, %220 : vector<16x1xf32>
    %222 = math.rsqrt %221 : vector<16x1xf32>
    %223 = vector.broadcast %212 : vector<16x1xf32> to vector<16x32xf32>
    %224 = arith.subf %208, %223 : vector<16x32xf32>
    %225 = vector.broadcast %222 : vector<16x1xf32> to vector<16x32xf32>
    %226 = vector.broadcast %5 : vector<1x32xf32> to vector<16x32xf32>
    %227 = arith.mulf %225, %226 : vector<16x32xf32>
    %228 = arith.mulf %224, %227 : vector<16x32xf32>
    %229 = vector.broadcast %6 : vector<1x32xf32> to vector<16x32xf32>
    %230 = arith.addf %228, %229 : vector<16x32xf32>
    %c0_88 = arith.constant 0 : index
    %c0_89 = arith.constant 0 : index
    %231 = vector.load %arg10[%c0_88, %c0_89] : memref<16x32xf32, #tpu.memory_space<vmem>>, vector<16x32xf32>
    tpu.vector_store %arg10[%c0_88, %c0_89], %230 {strides = array<i32>} : memref<16x32xf32, #tpu.memory_space<vmem>>, vector<16x32xf32>,
    return
  }
  func.func @transform_0(%arg0: i32) -> (i32, i32) {
    %c0_i32 = arith.constant 0 : i32
    %c0_i32_0 = arith.constant 0 : i32
    return %arg0, %c0_i32 : i32, i32
  }
  func.func @transform_1(%arg0: i32) -> (i32, i32, i32) {
    %c0_i32 = arith.constant 0 : i32
    %c0_i32_0 = arith.constant 0 : i32
    %c0_i32_1 = arith.constant 0 : i32
    return %arg0, %c0_i32, %c0_i32_0 : i32, i32, i32
  }
  func.func @transform_2(%arg0: i32) -> (i32, i32) {
    %c0_i32 = arith.constant 0 : i32
    %c0_i32_0 = arith.constant 0 : i32
    %c0_i32_1 = arith.constant 0 : i32
    return %c0_i32, %c0_i32_0 : i32, i32
  }
  func.func @transform_3(%arg0: i32) -> (i32, i32) {
    %c0_i32 = arith.constant 0 : i32
    %c0_i32_0 = arith.constant 0 : i32
    %c0_i32_1 = arith.constant 0 : i32
    return %c0_i32, %c0_i32_0 : i32, i32
  }
  func.func @transform_4(%arg0: i32) -> (i32, i32) {
    %c0_i32 = arith.constant 0 : i32
    %c0_i32_0 = arith.constant 0 : i32
    %c0_i32_1 = arith.constant 0 : i32
    return %c0_i32, %c0_i32_0 : i32, i32
  }
  func.func @transform_5(%arg0: i32) -> (i32, i32) {
    %c0_i32 = arith.constant 0 : i32
    %c0_i32_0 = arith.constant 0 : i32
    %c0_i32_1 = arith.constant 0 : i32
    return %c0_i32, %c0_i32_0 : i32, i32
  }
  func.func @transform_6(%arg0: i32) -> (i32, i32) {
    %c0_i32 = arith.constant 0 : i32
    %c0_i32_0 = arith.constant 0 : i32
    %c0_i32_1 = arith.constant 0 : i32
    return %c0_i32, %c0_i32_0 : i32, i32
  }
  func.func @transform_7(%arg0: i32) -> (i32, i32) {
    %c0_i32 = arith.constant 0 : i32
    %c0_i32_0 = arith.constant 0 : i32
    %c0_i32_1 = arith.constant 0 : i32
    return %c0_i32, %c0_i32_0 : i32, i32
  }
  func.func @transform_8(%arg0: i32) -> (i32, i32) {
    %c0_i32 = arith.constant 0 : i32
    %c0_i32_0 = arith.constant 0 : i32
    %c0_i32_1 = arith.constant 0 : i32
    return %c0_i32, %c0_i32_0 : i32, i32
  }
  func.func @transform_9(%arg0: i32) -> (i32, i32) {
    %c0_i32 = arith.constant 0 : i32
    %c0_i32_0 = arith.constant 0 : i32
    return %arg0, %c0_i32 : i32, i32
  }
}

</mosaic_0001>

<bundles_post_ra>
// kernel: tpu_custom_call.1
= control target key start
LH: loop header
LB: loop body
LE: loop exit
PB: predicated region body
PF: predicated region fallthrough
CT: control target
= control target key end

     0   :  { %14 = vsyncpa [#allocation4], 0  ;;  %s2636_s0 = inlined_call_operand.hbm [shape: f32[16,32], index: 0, kind: input, shape index: {}]   ;;  %s2637_s1 = inlined_call_operand.vmem [shape: f32[2,1,8], index: 1, kind: input, shape index: {}]   ;;  %s2638_s2 = inlined_call_operand.vmem [shape: f32[32,96], index: 2, kind: input, shape index: {}]   ;;  %s2639_s3 = inlined_call_operand.vmem [shape: f32[1,96], index: 3, kind: input, shape index: {}]   ;;  %s2640_s4 = inlined_call_operand.vmem [shape: f32[32,32], index: 4, kind: input, shape index: {}]   ;;  %s2641_s5 = inlined_call_operand.vmem [shape: f32[32,64], index: 5, kind: input, shape index: {}]   ;;  %s2642_s6 = inlined_call_operand.vmem [shape: f32[64,32], index: 6, kind: input, shape index: {}]   ;;  %s2643_s7 = inlined_call_operand.vmem [shape: f32[1,64], index: 7, kind: input, shape index: {}]   ;;  %s2644_s8 = inlined_call_operand.vmem [shape: f32[6,32], index: 8, kind: input, shape index: {}]   ;;  %s2645_s9 = inlined_call_operand.hbm [shape: f32[16,32], index: 9, kind: output, shape index: {}]  }
   0x1   :  { %15 = vsyncpa [#allocation5], 0  ;;  %s2282_s30 = smov [#allocation3]   ;;  %s2234_s13 = scalar_lea.hbm %s2636_s0, 256 }
   0x2   :  { %s21_s10 = sshll.u32 %s2282_s30, 4  ;;  %p2235_p0 = scmp.ne.s32.totalorder %s2636_s0, %s2234_s13  ;;  %s22_s10 = int_to_ptr.vmem [resolvable:$true] %s21_s10 }
   0x3   :  { %p2238_p1 = scmp.lt.u32.totalorder %s2234_s13, %s2636_s0 }
   0x5   :  { %p2240_p2 = pnand %p2238_p1, %p2235_p0 }
   0x7   :  { %2243 = shalt.err (!%p2240_p2)
}
   0x8   :  { %s2244_s18 = scalar_lea.vmem %s22_s10, 256  ;;  %p2249_p4 = scmp.lt.s32.totalorder %s22_s10, %s22_s10 }
   0x9   :  { %p2245_p3 = scmp.ne.s32.totalorder %s22_s10, %s2244_s18  ;;  %p2250_p5 = scmp.lt.s32.totalorder %s2244_s18, %s2244_s18 }
   0xb   :  { %p2251_p6 = por %p2250_p5, %p2249_p4 }
   0xd   :  { %p2252_p7 = pnand %p2251_p6, %p2245_p3 }
   0xf   :  { %2255 = shalt.err (!%p2252_p7)
}
  0x10   :  { %s2283_s19 = smov 128   ;;  %s2284_s20 = smov 8  }
  0x11   :  { %27 = dma.hbm_to_vmem [thread:$0]  %s2636_s0, 256, %s22_s10, [#allocation4], %s2283_s19, %s2283_s19, %s2284_s20  }
  0x12   :  { %2278 = dma.done.wait [#allocation4], 256  }
  0x13   :  { %2279 = vsyncadd [#allocation4], 4294967040  ;;  %vm66_vm0 = vcmask 261120   ;;  %v55_v0 = vld [vmem:[%s2638_s2] sm:$0xff]  ;;  %v56_v1 = vld [vmem:[%s2638_s2 + $0x8] sm:$0xff]  ;;  %v2285_v8 = vmov 0.0  }
  0x14   :  { %v57_v2 = vld [vmem:[%s2638_s2 + $0x10] sm:$0xff]  ;;  %v2135_v3 = vpack.c.bf16 %v56_v1, %v55_v0  ;;  %v58_v4 = vld [vmem:[%s2638_s2 + $0x18] sm:$0xff]  ;;  %2024 = vmatprep.subr.mxu0 %v2285_v8  ;;  %vm2286_vm1 = vmmov 0   ;;  %v1900_v9 = vld [vmem:[%s2639_s3] ss:$0 sm:$0xff]  ;;  %s2287_s10 = smov 96  }
  0x15   :  { %v2378_v5 = vld [vmem:[#allocation3] sm:$0xff]  ;;  %v2139_v6 = vpack.c.bf16 %v58_v4, %v57_v2  ;;  %v2382_v7 = vld [vmem:[#allocation3 + $0x8] sm:$0xff]  ;;  %2026 = vmatprep.mubr.msk.f32.mxu0 %vm2286_vm1, %v2285_v8  ;;  %s2288_s11 = smov 120   ;;  %s2289_s12 = smov 88   ;;  %vm160_vm2 = vcmask 64512   ;;  %vm493_vm3 = vcmask 130112  }
  0x16   :  { %2011 = vmatprep.mubr.msk.f32.mxu1 %vm66_vm0, %v2378_v5  ;;  %2136 = vmatprep.subr.bf16.mxu1 %v2135_v3  ;;  %s2290_s13 = smov 80   ;;  %s2291_s14 = smov 112   ;;  %v1903_v31 = vld [vmem:[%s2637_s1] ss:$0 sm:$0xff]  ;;  %v1917_v47 = vld [vmem:[%s2637_s1 + $0x1] ss:$0 sm:$0xff] }
  0x17   :  { %2138 = vmatpush3.bf16.msra.mxu1 %v2135_v3  ;;  %s2292_s3 = smov 72   ;;  %s2293_s15 = smov 104   ;;  %vm664_vm4 = vcmask 195712   ;;  %vm835_vm5 = vcmask 261312   ;;  %vm1759_vm6 = vcmask 523264  }
  0x18   :  { %2140 = vmatprep.subr.bf16.mxu1 %v2139_v6  ;;  %s2294_s16 = smov 64   ;;  %s2295_s17 = smov 56  }
  0x19   :  { %s2296_s1 = smov 40   ;;  %s2297_s24 = smov 48  }
  0x1a   :  { %s2298_s25 = smov 16   ;;  %s2299_s26 = smov 24  }
  0x1b   :  { %2142 = vmatpush3.bf16.msra.mxu1 %v2139_v6  ;;  %s2300_s23 = smov [#allocation6]  }
  0x1c   :  { %2014 = vmatprep.subr.mxu1 %v2285_v8 }
  0x1e   :  { %2012 = vmatmul.mubr.msk.f32.vlgmr.msra.gmra.mrb[0].mxu1 %vm66_vm0, %v2382_v7 }
  0x1f   :  { %2016 = vmatprep.mubr.msk.f32.mxu1 %vm2286_vm1, %v2285_v8 }
  0xf1   :  { %v2013_v10 = vpop.f32.mrb[0].mxu1 }
  0xf2   :  { %v139_v11 = vpop.f32.mrb[1].mxu1  ;;  %v2402_v14 = vadd.f32 %v2013_v10, %v1900_v9 }
  0xf3   :  { %v2395_v12 = vadd.f32 %v1900_v9, %v139_v11 }
  0xf4   :  { %v149_v15 = vmul.f32 0.35355338, %v2402_v14 }
  0xf5   :  { %158 = vrot.lane.b32.xlu0 %v2395_v12, %s2287_s10  ;;  %v148_v13 = vmul.f32 0.35355338, %v2395_v12 }
  0xf7   :  { %324 = vrot.lane.b32.xlu1 %v148_v13, %s2288_s11 }
  0xf9   :  { %326 = vrot.lane.b32.xlu0 %v2395_v12, %s2289_s12 }
  0xfb   :  { %497 = vrot.lane.b32.xlu1 %v2395_v12, %s2290_s13 }
  0xfd   :  { %495 = vrot.lane.b32.xlu0 %v148_v13, %s2291_s14 }
  0xff   :  { %668 = vrot.lane.b32.xlu1 %v2395_v12, %s2292_s3 }
 0x101   :  { %666 = vrot.lane.b32.xlu0 %v148_v13, %s2293_s15 }
 0x103   :  { %846 = vrot.lane.b32.xlu1 %v2402_v14, %s2287_s10 }
 0x105   :  { %1013 = vrot.lane.b32.xlu0 %v2402_v14, %s2289_s12 }
 0x107   :  { %1011 = vrot.lane.b32.xlu1 %v149_v15, %s2288_s11 }
 0x109   :  { %1183 = vrot.lane.b32.xlu0 %v2402_v14, %s2290_s13 }
 0x10b   :  { %1181 = vrot.lane.b32.xlu1 %v149_v15, %s2291_s14 }
 0x10d   :  { %1353 = vrot.lane.b32.xlu0 %v2402_v14, %s2292_s3 }
 0x10f   :  { %1351 = vrot.lane.b32.xlu1 %v149_v15, %s2293_s15 }
 0x111   :  { %247 = vrot.lane.b32.xlu0 %v2395_v12, %s2294_s16 }
 0x113   :  { %413 = vrot.lane.b32.xlu1 %v2395_v12, %s2295_s17 }
 0x167   :  { %v159_v16 = vpop.permute.xlu0 %158 }
 0x168   :  { %2015 = vmatpush3.xpose.msk.msra.mxu1 %vm160_vm2, %v159_v16 }
 0x169   :  { %v325_v17 = vpop.permute.xlu1 %324  ;;  %2019 = vmatprep.subr.mxu1 %v2285_v8 }
 0x16b   :  { %v327_v18 = vpop.permute.xlu0 %326  ;;  %2017 = vmatmul.mubr.msk.f32.vlgmr.msra.gmra.mrb[2].mxu1 %vm160_vm2, %v148_v13 }
 0x16c   :  { %2025 = vmatpush3.xpose.msk.msra.mxu0 %vm160_vm2, %v327_v18  ;;  %2021 = vmatprep.mubr.msk.f32.mxu1 %vm2286_vm1, %v2285_v8 }
 0x16d   :  { %v498_v19 = vpop.permute.xlu1 %497  ;;  %2034 = vmatprep.subr.mxu0 %v2285_v8 }
 0x16f   :  { %v496_v20 = vpop.permute.xlu0 %495  ;;  %2027 = vmatmul.mubr.msk.f32.vlgmr.msra.gmra.mrb[0].mxu0 %vm160_vm2, %v325_v17 }
 0x170   :  { %2035 = vmatpush3.xpose.msk.msra.mxu0 %vm160_vm2, %v498_v19  ;;  %2036 = vmatprep.mubr.msk.f32.mxu0 %vm2286_vm1, %v2285_v8 }
 0x171   :  { %v669_v21 = vpop.permute.xlu1 %668  ;;  %2044 = vmatprep.subr.mxu0 %v2285_v8 }
 0x173   :  { %v667_v22 = vpop.permute.xlu0 %666  ;;  %2037 = vmatmul.mubr.msk.f32.vlgmr.msra.gmra.mrb[2].mxu0 %vm160_vm2, %v496_v20 }
 0x174   :  { %2045 = vmatpush3.xpose.msk.msra.mxu0 %vm160_vm2, %v669_v21  ;;  %2046 = vmatprep.mubr.msk.f32.mxu0 %vm2286_vm1, %v2285_v8 }
 0x175   :  { %v847_v23 = vpop.permute.xlu1 %846  ;;  %2054 = vmatprep.subr.mxu0 %v2285_v8 }
 0x177   :  { %v1014_v24 = vpop.permute.xlu0 %1013  ;;  %2047 = vmatmul.mubr.msk.f32.vlgmr.msra.gmra.mrb[4].mxu0 %vm160_vm2, %v667_v22 }
 0x178   :  { %2055 = vmatpush3.xpose.msk.msra.mxu0 %vm160_vm2, %v847_v23  ;;  %2056 = vmatprep.mubr.msk.f32.mxu0 %vm2286_vm1, %v2285_v8 }
 0x179   :  { %2064 = vmatprep.subr.mxu0 %v2285_v8  ;;  %v1012_v25 = vpop.permute.xlu1 %1011 }
 0x17b   :  { %v1184_v26 = vpop.permute.xlu0 %1183  ;;  %2057 = vmatmul.mubr.msk.f32.vlgmr.msra.gmra.mrb[6].mxu0 %vm160_vm2, %v149_v15 }
 0x17c   :  { %2065 = vmatpush3.xpose.msk.msra.mxu0 %vm160_vm2, %v1014_v24  ;;  %2066 = vmatprep.mubr.msk.f32.mxu0 %vm2286_vm1, %v2285_v8 }
 0x17d   :  { %2074 = vmatprep.subr.mxu0 %v2285_v8  ;;  %v1182_v28 = vpop.permute.xlu1 %1181 }
 0x17f   :  { %v1354_v27 = vpop.permute.xlu0 %1353  ;;  %2067 = vmatmul.mubr.msk.f32.vlgmr.msra.gmra.mrb[8].mxu0 %vm160_vm2, %v1012_v25 }
 0x180   :  { %2075 = vmatpush3.xpose.msk.msra.mxu0 %vm160_vm2, %v1184_v26  ;;  %2076 = vmatprep.mubr.msk.f32.mxu0 %vm2286_vm1, %v2285_v8 }
 0x181   :  { %2084 = vmatprep.subr.mxu0 %v2285_v8  ;;  %v1352_v30 = vpop.permute.xlu1 %1351 }
 0x183   :  { %v248_v29 = vpop.permute.xlu0 %247  ;;  %2077 = vmatmul.mubr.msk.f32.vlgmr.msra.gmra.mrb[10].mxu0 %vm160_vm2, %v1182_v28 }
 0x184   :  { %2020 = vmatpush3.msra.mxu1 %v248_v29  ;;  %2085 = vmatpush3.xpose.msk.msra.mxu0 %vm160_vm2, %v1354_v27 }
 0x185   :  { %2086 = vmatprep.mubr.msk.f32.mxu0 %vm2286_vm1, %v2285_v8  ;;  %2029 = vmatprep.subr.mxu1 %v2285_v8  ;;  %v2469_v1 = vpop.permute.xlu1 %413 }
 0x187   :  { %2087 = vmatmul.mubr.msk.f32.vlgmr.msra.gmra.mrb[12].mxu0 %vm160_vm2, %v1352_v30 }
 0x23e   :  { %v232_v32 = vpop.f32.mrb[2].mxu1 }
 0x23f   :  { %v233_v33 = vadd.f32 %v1903_v31, %v232_v32  ;;  %v2018_v34 = vpop.f32.mrb[3].mxu1 }
 0x241   :  { %v236_v35 = vsel %vm160_vm2, %v233_v33, -inf }
 0x242   :  { %v398_v36 = vpop.f32.mrb[0].mxu0  ;;  %237 = vmax.xlane.f32.xlu0 %v236_v35 }
 0x243   :  { %v399_v37 = vadd.f32 %v1903_v31, %v398_v36  ;;  %v2028_v38 = vpop.f32.mrb[1].mxu0 }
 0x245   :  { %v402_v39 = vsel %vm160_vm2, %v399_v37, -inf }
 0x246   :  { %403 = vmax.xlane.f32.xlu1 %v402_v39  ;;  %v569_v40 = vpop.f32.mrb[2].mxu0 }
 0x247   :  { %v570_v41 = vadd.f32 %v1903_v31, %v569_v40  ;;  %v2038_v42 = vpop.f32.mrb[3].mxu0 }
 0x249   :  { %v573_v43 = vsel %vm160_vm2, %v570_v41, -inf }
 0x24a   :  { %v740_v44 = vpop.f32.mrb[4].mxu0  ;;  %574 = vmax.xlane.f32.xlu0 %v573_v43 }
 0x24b   :  { %v741_v45 = vadd.f32 %v1903_v31, %v740_v44  ;;  %v2048_v46 = vpop.f32.mrb[5].mxu0 }
 0x24d   :  { %v744_v48 = vsel %vm160_vm2, %v741_v45, -inf }
 0x24e   :  { %v919_v49 = vpop.f32.mrb[6].mxu0  ;;  %745 = vmax.xlane.f32.xlu0 %v744_v48 }
 0x24f   :  { %v920_v50 = vadd.f32 %v1917_v47, %v919_v49  ;;  %v2058_v51 = vpop.f32.mrb[7].mxu0 }
 0x251   :  { %v923_v52 = vsel %vm160_vm2, %v920_v50, -inf }
 0x252   :  { %924 = vmax.xlane.f32.xlu1 %v923_v52  ;;  %v1085_v53 = vpop.f32.mrb[8].mxu0 }
 0x253   :  { %v1086_v54 = vadd.f32 %v1917_v47, %v1085_v53  ;;  %v2068_v55 = vpop.f32.mrb[9].mxu0 }
 0x255   :  { %v1089_v56 = vsel %vm160_vm2, %v1086_v54, -inf }
 0x256   :  { %v1255_v57 = vpop.f32.mrb[10].mxu0  ;;  %1090 = vmax.xlane.f32.xlu0 %v1089_v56 }
 0x257   :  { %v1256_v58 = vadd.f32 %v1917_v47, %v1255_v57  ;;  %v2078_v59 = vpop.f32.mrb[11].mxu0 }
 0x259   :  { %v1259_v60 = vsel %vm160_vm2, %v1256_v58, -inf }
 0x25a   :  { %1260 = vmax.xlane.f32.xlu1 %v1259_v60  ;;  %v1425_v61 = vpop.f32.mrb[12].mxu0 }
 0x25b   :  { %v1426_v62 = vadd.f32 %v1917_v47, %v1425_v61  ;;  %v2088_v63 = vpop.f32.mrb[13].mxu0 }
 0x25d   :  { %v1429_v0 = vsel %vm160_vm2, %v1426_v62, -inf }
 0x25e   :  { %1430 = vmax.xlane.f32.xlu0 %v1429_v0 }
 0x26b   :  { %755 = vrot.lane.b32.xlu1 %v2395_v12, %s2296_s1 }
 0x274   :  { %584 = vrot.lane.b32.xlu0 %v2395_v12, %s2297_s24 }
 0x2cf   :  { %v238_v2 = vpop.xlane.xlu0 %237 }
 0x2d0   :  { %v239_v3 = vsub.f32 %v233_v33, %v238_v2 }
 0x2d2   :  { %v240_v4 = vmul.f32 1.442695, %v239_v3 }
 0x2d3   :  { %v404_v6 = vpop.xlane.xlu1 %403 }
 0x2d4   :  { %2194 = vpow2.f32 %v240_v4  ;;  %v405_v9 = vsub.f32 %v399_v37, %v404_v6 }
 0x2d6   :  { %v406_v10 = vmul.f32 1.442695, %v405_v9 }
 0x2d7   :  { %v575_v11 = vpop.xlane.xlu0 %574 }
 0x2d8   :  { %2196 = vpow2.f32 %v406_v10  ;;  %v576_v13 = vsub.f32 %v570_v41, %v575_v11 }
 0x2da   :  { %v577_v15 = vmul.f32 1.442695, %v576_v13 }
 0x2db   :  { %v746_v16 = vpop.xlane.xlu0 %745 }
 0x2dc   :  { %2198 = vpow2.f32 %v577_v15  ;;  %v747_v17 = vsub.f32 %v741_v45, %v746_v16 }
 0x2de   :  { %v2195_v18 = vpop.eup %2194  ;;  %v748_v19 = vmul.f32 1.442695, %v747_v17 }
 0x2df   :  { %v242_v12 = vsel %vm160_vm2, %v2195_v18, 0.0  ;;  %v925_v26 = vpop.xlane.xlu1 %924 }
 0x2e0   :  { %2200 = vpow2.f32 %v748_v19  ;;  %243 = vadd.xlane.f32.xlu1 %v242_v12  ;;  %v926_v27 = vsub.f32 %v920_v50, %v925_v26 }
 0x2e2   :  { %v2197_v20 = vpop.eup %2196  ;;  %v927_v31 = vmul.f32 1.442695, %v926_v27  ;;  %v1525_v27 = vld [vmem:[%s2640_s4 + $0x10] sm:$0xff] }
 0x2e3   :  { %v408_v21 = vsel %vm160_vm2, %v2197_v20, 0.0  ;;  %v1091_v28 = vpop.xlane.xlu0 %1090 }
 0x2e4   :  { %409 = vadd.xlane.f32.xlu0 %v408_v21  ;;  %v1092_v30 = vsub.f32 %v1086_v54, %v1091_v28  ;;  %2202 = vpow2.f32 %v927_v31  ;;  %v1526_v28 = vld [vmem:[%s2640_s4 + $0x18] sm:$0xff] }
 0x2e6   :  { %v2199_v22 = vpop.eup %2198  ;;  %v1093_v34 = vmul.f32 1.442695, %v1092_v30 }
 0x2e7   :  { %v579_v23 = vsel %vm160_vm2, %v2199_v22, 0.0  ;;  %v1261_v29 = vpop.xlane.xlu1 %1260 }
 0x2e8   :  { %580 = vadd.xlane.f32.xlu1 %v579_v23  ;;  %v1262_v32 = vsub.f32 %v1256_v58, %v1261_v29  ;;  %2204 = vpow2.f32 %v1093_v34  ;;  %v1524_v23 = vld [vmem:[%s2640_s4 + $0x8] sm:$0xff]  ;;  %v2147_v29 = vpack.c.bf16 %v1526_v28, %v1525_v27 }
 0x2ea   :  { %v2474_v24 = vpop.eup %2200  ;;  %v1263_v35 = vmul.f32 1.442695, %v1262_v32 }
 0x2eb   :  { %v750_v25 = vsel %vm160_vm2, %v2474_v24, 0.0  ;;  %v1431_v33 = vpop.xlane.xlu0 %1430  ;;  %v756_v46 = vpop.permute.xlu1 %755 }
 0x2ec   :  { %751 = vadd.xlane.f32.xlu0 %v750_v25  ;;  %v1432_v36 = vsub.f32 %v1426_v62, %v1431_v33  ;;  %2206 = vpow2.f32 %v1263_v35 }
 0x2ee   :  { %v1433_v37 = vmul.f32 1.442695, %v1432_v36  ;;  %v2203_v38 = vpop.eup %2202 }
 0x2ef   :  { %v929_v40 = vsel %vm160_vm2, %v2203_v38, 0.0  ;;  %v585_v47 = vpop.permute.xlu0 %584 }
 0x2f0   :  { %2208 = vpow2.f32 %v1433_v37 }
 0x2f2   :  { %v2482_v39 = vpop.eup %2204 }
 0x2f3   :  { %v1095_v43 = vsel %vm160_vm2, %v2482_v39, 0.0 }
 0x2f6   :  { %v2485_v41 = vpop.eup %2206 }
 0x2f7   :  { %v1265_v42 = vsel %vm160_vm2, %v2485_v41, 0.0 }
 0x2f9   :  { %1100 = vrot.lane.b32.xlu1 %v2402_v14, %s2295_s17 }
 0x2fa   :  { %v2491_v44 = vpop.eup %2208 }
 0x2fb   :  { %v1435_v45 = vsel %vm160_vm2, %v2491_v44, 0.0 }
 0x302   :  { %934 = vrot.lane.b32.xlu0 %v2402_v14, %s2294_s16 }
 0x31d   :  { %930 = vadd.xlane.f32.xlu1 %v929_v40 }
 0x321   :  { %1266 = vadd.xlane.f32.xlu1 %v1265_v42  ;;  %1096 = vadd.xlane.f32.xlu0 %v1095_v43 }
 0x325   :  { %1436 = vadd.xlane.f32.xlu1 %v1435_v45 }
 0x336   :  { %1440 = vrot.lane.b32.xlu1 %v2402_v14, %s2296_s1  ;;  %s1888_s1 = sshll.u32 %s2300_s23, 4  ;;  %s1889_s1 = int_to_ptr.vmem [resolvable:$true] %s1888_s1 }
 0x337   :  { %1270 = vrot.lane.b32.xlu0 %v2402_v14, %s2297_s24  ;;  %s2256_s24 = scalar_lea.vmem %s1889_s1, 256  ;;  %p2261_p9 = scmp.lt.s32.totalorder %s1889_s1, %s1889_s1 }
 0x338   :  { %p2257_p8 = scmp.ne.s32.totalorder %s1889_s1, %s2256_s24  ;;  %p2262_p10 = scmp.lt.s32.totalorder %s2256_s24, %s2256_s24 }
 0x33a   :  { %p2263_p11 = por %p2262_p10, %p2261_p9 }
 0x33c   :  { %p2264_p12 = pnand %p2263_p11, %p2257_p8 }
 0x36d   :  { %v244_v48 = vpop.xlane.xlu1 %243 }
 0x36e   :  { %2210 = vrcp.f32 %v244_v48 }
 0x371   :  { %v410_v49 = vpop.xlane.xlu0 %409 }
 0x372   :  { %2212 = vrcp.f32 %v410_v49 }
 0x375   :  { %v581_v50 = vpop.xlane.xlu1 %580 }
 0x376   :  { %2214 = vrcp.f32 %v581_v50 }
 0x378   :  { %v2211_v51 = vpop.eup %2210 }
 0x379   :  { %v246_v52 = vmul.f32 %v2211_v51, %v2195_v18  ;;  %v752_v53 = vpop.xlane.xlu0 %751  ;;  %v1101_v60 = vpop.permute.xlu1 %1100 }
 0x37a   :  { %2216 = vrcp.f32 %v752_v53 }
 0x37b   :  { %2022 = vmatmul.mubr.msk.f32.vlgmr.msra.gmra.mrb[4].mxu1 %vm160_vm2, %v246_v52 }
 0x37c   :  { %v2213_v54 = vpop.eup %2212  ;;  %2030 = vmatpush3.msra.mxu1 %v2469_v1  ;;  %2031 = vmatprep.mubr.msk.f32.mxu1 %vm2286_vm1, %v2285_v8 }
 0x37d   :  { %v412_v14 = vmul.f32 %v2213_v54, %v2197_v20  ;;  %2039 = vmatprep.subr.mxu1 %v2285_v8  ;;  %v935_v59 = vpop.permute.xlu0 %934 }
 0x37f   :  { %2032 = vmatmul.mubr.msk.f32.vlgmr.msra.gmra.mrb[6].mxu1 %vm160_vm2, %v412_v14 }
 0x380   :  { %v2215_v55 = vpop.eup %2214  ;;  %2040 = vmatpush3.msra.mxu1 %v585_v47  ;;  %2041 = vmatprep.mubr.msk.f32.mxu1 %vm2286_vm1, %v2285_v8 }
 0x381   :  { %v583_v56 = vmul.f32 %v2215_v55, %v2199_v22  ;;  %2049 = vmatprep.subr.mxu1 %v2285_v8  ;;  %v1523_v22 = vld [vmem:[%s2640_s4] sm:$0xff] }
 0x382   :  { %v2143_v25 = vpack.c.bf16 %v1524_v23, %v1523_v22  ;;  %v1934_v23 = vld [vmem:[%s2644_s8 + $0x2] ss:$0 sm:$0xff] }
 0x383   :  { %2042 = vmatmul.mubr.msk.f32.vlgmr.msra.gmra.mrb[8].mxu1 %vm160_vm2, %v583_v56 }
 0x384   :  { %v2217_v57 = vpop.eup %2216  ;;  %2050 = vmatpush3.msra.mxu1 %v756_v46  ;;  %2051 = vmatprep.mubr.msk.f32.mxu1 %vm2286_vm1, %v2285_v8 }
 0x385   :  { %v754_v58 = vmul.f32 %v2217_v57, %v2474_v24  ;;  %2059 = vmatprep.subr.mxu1 %v2285_v8  ;;  %2144 = vmatprep.subr.bf16.mxu0 %v2143_v25 }
 0x386   :  { %2146 = vmatpush3.bf16.msra.mxu0 %v2143_v25 }
 0x387   :  { %2052 = vmatmul.mubr.msk.f32.vlgmr.msra.gmra.mrb[10].mxu1 %vm160_vm2, %v754_v58  ;;  %2148 = vmatprep.subr.bf16.mxu0 %v2147_v29 }
 0x388   :  { %2060 = vmatpush3.msra.mxu1 %v935_v59  ;;  %2061 = vmatprep.mubr.msk.f32.mxu1 %vm2286_vm1, %v2285_v8 }
 0x389   :  { %2069 = vmatprep.subr.mxu1 %v2285_v8 }
 0x38a   :  { %2150 = vmatpush3.bf16.msra.mxu0 %v2147_v29 }
 0x3aa   :  { %v931_v61 = vpop.xlane.xlu1 %930 }
 0x3ab   :  { %2218 = vrcp.f32 %v931_v61  ;;  %v1654_v61 = vld [vmem:[%s2641_s5 + $0x8] sm:$0xff] }
 0x3ae   :  { %v1267_v62 = vpop.xlane.xlu1 %1266  ;;  %v1097_v63 = vpop.xlane.xlu0 %1096 }
 0x3af   :  { %2220 = vrcp.f32 %v1097_v63  ;;  %v1655_v63 = vld [vmem:[%s2641_s5 + $0x10] sm:$0xff] }
 0x3b0   :  { %2222 = vrcp.f32 %v1267_v62 }
 0x3b2   :  { %v1437_v0 = vpop.xlane.xlu1 %1436  ;;  %v1271_v9 = vpop.permute.xlu0 %1270 }
 0x3b3   :  { %2224 = vrcp.f32 %v1437_v0  ;;  %v1656_v0 = vld [vmem:[%s2641_s5 + $0x18] sm:$0xff] }
 0x3b5   :  { %v2219_v1 = vpop.eup %2218 }
 0x3b6   :  { %v933_v2 = vmul.f32 %v2219_v1, %v2203_v38  ;;  %v1441_v13 = vpop.permute.xlu1 %1440  ;;  %v2155_v1 = vpack.c.bf16 %v1656_v0, %v1655_v63 }
 0x3b8   :  { %2062 = vmatmul.mubr.msk.f32.vlgmr.msra.gmra.mrb[12].mxu1 %vm160_vm2, %v933_v2  ;;  %v1747_v2 = vld [vmem:[%s2642_s6] sm:$0xff] }
 0x3b9   :  { %2070 = vmatpush3.msra.mxu1 %v1101_v60  ;;  %2071 = vmatprep.mubr.msk.f32.mxu1 %vm2286_vm1, %v2285_v8  ;;  %v2221_v3 = vpop.eup %2220 }
 0x3ba   :  { %2079 = vmatprep.subr.mxu1 %v2285_v8  ;;  %v1099_v4 = vmul.f32 %v2221_v3, %v2482_v39  ;;  %v2223_v6 = vpop.eup %2222  ;;  %v1748_v3 = vld [vmem:[%s2642_s6 + $0x8] sm:$0xff] }
 0x3bb   :  { %v1269_v10 = vmul.f32 %v2223_v6, %v2485_v41  ;;  %v2159_v6 = vpack.c.bf16 %v1748_v3, %v1747_v2  ;;  %v1942_v3 = vld [vmem:[%s2644_s8 + $0x5] ss:$0 sm:$0xff] }
 0x3bc   :  { %2072 = vmatmul.mubr.msk.f32.vlgmr.msra.gmra.mrb[14].mxu1 %vm160_vm2, %v1099_v4  ;;  %v1749_v4 = vld [vmem:[%s2642_s6 + $0x10] sm:$0xff] }
 0x3bd   :  { %2080 = vmatpush3.msra.mxu1 %v1271_v9  ;;  %2081 = vmatprep.mubr.msk.f32.mxu1 %vm2286_vm1, %v2285_v8  ;;  %v2225_v11 = vpop.eup %2224  ;;  %v1750_v9 = vld [vmem:[%s2642_s6 + $0x18] sm:$0xff] }
 0x3be   :  { %2089 = vmatprep.subr.mxu1 %v2285_v8  ;;  %v1439_v15 = vmul.f32 %v2225_v11, %v2491_v44  ;;  %v1930_v44 = vld [vmem:[%s2644_s8] ss:$0 sm:$0xff]  ;;  %2160 = vmatprep.subr.bf16.mxu0 %v2159_v6 }
 0x3bf   :  { %v1751_v11 = vld [vmem:[%s2642_s6 + $0x20] sm:$0xff] }
 0x3c0   :  { %2082 = vmatmul.mubr.msk.f32.vlgmr.msra.gmra.mrb[16].mxu1 %vm160_vm2, %v1269_v10  ;;  %v2163_v10 = vpack.c.bf16 %v1750_v9, %v1749_v4 }
 0x3c1   :  { %2090 = vmatpush3.msra.mxu1 %v1441_v13  ;;  %2091 = vmatprep.mubr.msk.f32.mxu1 %vm2286_vm1, %v2285_v8  ;;  %v1752_v13 = vld [vmem:[%s2642_s6 + $0x28] sm:$0xff] }
 0x3c4   :  { %2092 = vmatmul.mubr.msk.f32.vlgmr.msra.gmra.mrb[18].mxu1 %vm160_vm2, %v1439_v15  ;;  %v2167_v15 = vpack.c.bf16 %v1752_v13, %v1751_v11 }
 0x44e   :  { %v319_v16 = vpop.f32.mrb[4].mxu1 }
 0x44f   :  { %323 = vst.msk [vmem:[#allocation2] sm:$0xff] %vm160_vm2, %v319_v16  ;;  %v2023_v17 = vpop.f32.mrb[5].mxu1 }
 0x452   :  { %v485_v18 = vpop.f32.mrb[6].mxu1 }
 0x453   :  { %490 = vrot.lane.b32.xlu0 %v485_v18, %s2284_s20  ;;  %v2033_v19 = vpop.f32.mrb[7].mxu1 }
 0x456   :  { %v656_v12 = vpop.f32.mrb[8].mxu1 }
 0x457   :  { %661 = vrot.lane.b32.xlu1 %v656_v12, %s2298_s25  ;;  %v2043_v20 = vpop.f32.mrb[9].mxu1 }
 0x45a   :  { %v827_v21 = vpop.f32.mrb[10].mxu1 }
 0x45b   :  { %832 = vrot.lane.b32.xlu1 %v827_v21, %s2299_s26  ;;  %v2053_v8 = vpop.f32.mrb[11].mxu1  ;;  %v1933_v21 = vld [vmem:[%s2644_s8 + $0x1] ss:$0 sm:$0xff] }
 0x48b   :  { %v1006_v24 = vpop.f32.mrb[12].mxu1 }
 0x48c   :  { %1010 = vst.msk [vmem:[#allocation2 + $0x8] sm:$0xff] %vm160_vm2, %v1006_v24  ;;  %v2063_v26 = vpop.f32.mrb[13].mxu1 }
 0x48f   :  { %v1172_v30 = vpop.f32.mrb[14].mxu1 }
 0x490   :  { %1177 = vrot.lane.b32.xlu0 %v1172_v30, %s2284_s20  ;;  %v2073_v31 = vpop.f32.mrb[15].mxu1  ;;  %v1753_v30 = vld [vmem:[%s2642_s6 + $0x30] sm:$0xff] }
 0x491   :  { %v1754_v31 = vld [vmem:[%s2642_s6 + $0x38] sm:$0xff] }
 0x493   :  { %v1342_v32 = vpop.f32.mrb[16].mxu1 }
 0x494   :  { %1347 = vrot.lane.b32.xlu0 %v1342_v32, %s2298_s25  ;;  %v2083_v33 = vpop.f32.mrb[17].mxu1  ;;  %v2171_v32 = vpack.c.bf16 %v1754_v31, %v1753_v30 }
 0x495   :  { %v1935_v33 = vld [vmem:[%s2643_s7] ss:$0 sm:$0xff] }
 0x497   :  { %v1512_v34 = vpop.f32.mrb[18].mxu1 }
 0x498   :  { %1517 = vrot.lane.b32.xlu1 %v1512_v34, %s2299_s26  ;;  %v2093_v35 = vpop.f32.mrb[19].mxu1 }
 0x4c5   :  { %v491_v36 = vpop.permute.xlu0 %490 }
 0x4c6   :  { %494 = vst.msk [vmem:[#allocation2] sm:$0xff] %vm493_vm3, %v491_v36 }
 0x4c9   :  { %v662_v37 = vpop.permute.xlu1 %661 }
 0x4ca   :  { %665 = vst.msk [vmem:[#allocation2] sm:$0xff] %vm664_vm4, %v662_v37 }
 0x4cd   :  { %v833_v38 = vpop.permute.xlu1 %832 }
 0x4ce   :  { %836 = vst.msk [vmem:[#allocation2] sm:$0xff] %vm835_vm5, %v833_v38 }
 0x4d5   :  { %v1521_v39 = vld [vmem:[#allocation2] sm:$0xff] }
 0x4d6   :  { %2102 = vmatprep.mubr.msk.f32.mxu0 %vm66_vm0, %v1521_v39 }
 0x502   :  { %v1178_v40 = vpop.permute.xlu0 %1177 }
 0x503   :  { %1180 = vst.msk [vmem:[#allocation2 + $0x8] sm:$0xff] %vm493_vm3, %v1178_v40  ;;  %v1938_v40 = vld [vmem:[%s2644_s8 + $0x3] ss:$0 sm:$0xff] }
 0x506   :  { %v1348_v41 = vpop.permute.xlu0 %1347 }
 0x507   :  { %1350 = vst.msk [vmem:[#allocation2 + $0x8] sm:$0xff] %vm664_vm4, %v1348_v41 }
 0x50a   :  { %v1518_v42 = vpop.permute.xlu1 %1517 }
 0x50b   :  { %1520 = vst.msk [vmem:[#allocation2 + $0x8] sm:$0xff] %vm835_vm5, %v1518_v42 }
 0x512   :  { %v1522_v43 = vld [vmem:[#allocation2 + $0x8] sm:$0xff] }
 0x513   :  { %2103 = vmatmul.mubr.msk.f32.vlgmr.msra.gmra.mrb[14].mxu0 %vm66_vm0, %v1522_v43 }
 0x514   :  { %2162 = vmatpush3.bf16.msra.mxu0 %v2159_v6 }
 0x515   :  { %2164 = vmatprep.subr.bf16.mxu0 %v2163_v10 }
 0x518   :  { %2166 = vmatpush3.bf16.msra.mxu0 %v2163_v10 }
 0x519   :  { %2168 = vmatprep.subr.bf16.mxu0 %v2167_v15 }
 0x51c   :  { %2170 = vmatpush3.bf16.msra.mxu0 %v2167_v15 }
 0x51d   :  { %2172 = vmatprep.subr.bf16.mxu0 %v2171_v32 }
 0x520   :  { %2174 = vmatpush3.bf16.msra.mxu0 %v2171_v32 }
 0x5e6   :  { %v2104_v45 = vpop.f32.mrb[14].mxu0 }
 0x5e7   :  { %v1609_v46 = vadd.f32 %v2104_v45, %v1930_v44  ;;  %v1603_v47 = vpop.f32.mrb[15].mxu0 }
 0x5e8   :  { %v1604_v48 = vadd.f32 %v1930_v44, %v1603_v47 }
 0x5e9   :  { %v1613_v49 = vadd.f32 %v1609_v46, %v2382_v7 }
 0x5ea   :  { %v1612_v50 = vadd.f32 %v1604_v48, %v2378_v5  ;;  %v1653_v5 = vld [vmem:[%s2641_s5] sm:$0xff] }
 0x5eb   :  { %v1617_v51 = vsel %vm66_vm0, %v1613_v49, 0.0  ;;  %v2151_v62 = vpack.c.bf16 %v1654_v61, %v1653_v5 }
 0x5ec   :  { %1618 = vadd.xlane.f32.xlu1 %v1617_v51  ;;  %v1614_v52 = vsel %vm66_vm0, %v1612_v50, 0.0 }
 0x5ed   :  { %1615 = vadd.xlane.f32.xlu0 %v1614_v52  ;;  %2152 = vmatprep.subr.bf16.mxu1 %v2151_v62 }
 0x5ee   :  { %2154 = vmatpush3.bf16.msra.mxu1 %v2151_v62  ;;  %v1941_v62 = vld [vmem:[%s2644_s8 + $0x4] ss:$0 sm:$0xff] }
 0x5ef   :  { %2156 = vmatprep.subr.bf16.mxu1 %v2155_v1 }
 0x5f2   :  { %2158 = vmatpush3.bf16.msra.mxu1 %v2155_v1 }
 0x679   :  { %v1619_v53 = vpop.xlane.xlu1 %1618 }
 0x67a   :  { %v1622_v54 = vmul.f32 0.03125, %v1619_v53  ;;  %v1616_v14 = vpop.xlane.xlu0 %1615 }
 0x67b   :  { %v1621_v55 = vmul.f32 0.03125, %v1616_v14 }
 0x67c   :  { %v1624_v56 = vsub.f32 %v1613_v49, %v1622_v54 }
 0x67d   :  { %v1623_v57 = vsub.f32 %v1612_v50, %v1621_v55 }
 0x67e   :  { %v1626_v60 = vmul.f32 %v1624_v56, %v1624_v56 }
 0x67f   :  { %v1625_v58 = vmul.f32 %v1623_v57, %v1623_v57 }
 0x680   :  { %v1630_v7 = vsel %vm66_vm0, %v1626_v60, 0.0 }
 0x681   :  { %v1627_v59 = vsel %vm66_vm0, %v1625_v58, 0.0 }
 0x682   :  { %1628 = vadd.xlane.f32.xlu0 %v1627_v59 }
 0x686   :  { %1631 = vadd.xlane.f32.xlu0 %v1630_v7 }
 0x70f   :  { %v1629_v16 = vpop.xlane.xlu0 %1628 }
 0x710   :  { %v1633_v17 = vmul.f32 0.03125, %v1629_v16 }
 0x712   :  { %v1635_v18 = vadd.f32 1e-12, %v1633_v17 }
 0x713   :  { %v1632_v19 = vpop.xlane.xlu0 %1631 }
 0x714   :  { %2226 = vrsqrt.f32 %v1635_v18  ;;  %v1634_v12 = vmul.f32 0.03125, %v1632_v19 }
 0x716   :  { %v1636_v20 = vadd.f32 1e-12, %v1634_v12 }
 0x718   :  { %2228 = vrsqrt.f32 %v1636_v20 }
 0x71e   :  { %v2227_v8 = vpop.eup %2226 }
 0x71f   :  { %v1643_v22 = vmul.f32 %v2227_v8, %v1933_v21 }
 0x721   :  { %v1645_v24 = vmul.f32 %v1643_v22, %v1623_v57 }
 0x722   :  { %v2229_v25 = vpop.eup %2228 }
 0x723   :  { %v1644_v26 = vmul.f32 %v2229_v25, %v1933_v21  ;;  %v1651_v27 = vadd.f32 %v1934_v23, %v1645_v24 }
 0x725   :  { %v1646_v28 = vmul.f32 %v1644_v26, %v1624_v56  ;;  %2113 = vmatprep.mubr.msk.f32.mxu1 %vm66_vm0, %v1651_v27 }
 0x727   :  { %v1652_v29 = vadd.f32 %v1934_v23, %v1646_v28 }
 0x729   :  { %2114 = vmatmul.mubr.msk.f32.vlgmr.msra.gmra.mrb[20].mxu1 %vm66_vm0, %v1652_v29 }
 0x7fc   :  { %v2115_v34 = vpop.f32.mrb[20].mxu1 }
 0x7fd   :  { %v1742_v35 = vadd.f32 %v2115_v34, %v1935_v33  ;;  %v1736_v36 = vpop.f32.mrb[21].mxu1 }
 0x7fe   :  { %v1737_v37 = vadd.f32 %v1935_v33, %v1736_v36 }
 0x7ff   :  { %v1746_v39 = vmax.f32 %v1742_v35, 0.0 }
 0x800   :  { %v1745_v38 = vmax.f32 %v1737_v37, 0.0 }
 0x802   :  { %2132 = vmatprep.mubr.msk.f32.mxu0 %vm1759_vm6, %v1745_v38 }
 0x803   :  { %2133 = vmatmul.mubr.msk.f32.vlgmr.msra.gmra.mrb[16].mxu0 %vm1759_vm6, %v1746_v39 }
 0x8d6   :  { %v2134_v41 = vpop.f32.mrb[16].mxu0 }
 0x8d7   :  { %v1838_v42 = vadd.f32 %v2134_v41, %v1938_v40  ;;  %v1832_v43 = vpop.f32.mrb[17].mxu0 }
 0x8d8   :  { %v1833_v44 = vadd.f32 %v1938_v40, %v1832_v43 }
 0x8d9   :  { %v1842_v45 = vadd.f32 %v1838_v42, %v1652_v29 }
 0x8da   :  { %v1841_v46 = vadd.f32 %v1833_v44, %v1651_v27 }
 0x8db   :  { %v1846_v47 = vsel %vm66_vm0, %v1842_v45, 0.0 }
 0x8dc   :  { %1847 = vadd.xlane.f32.xlu0 %v1846_v47  ;;  %v1843_v48 = vsel %vm66_vm0, %v1841_v46, 0.0 }
 0x8dd   :  { %1844 = vadd.xlane.f32.xlu1 %v1843_v48 }
 0x969   :  { %v1848_v49 = vpop.xlane.xlu0 %1847 }
 0x96a   :  { %v1850_v50 = vmul.f32 0.03125, %v1848_v49  ;;  %v1845_v51 = vpop.xlane.xlu1 %1844 }
 0x96b   :  { %v1849_v52 = vmul.f32 0.03125, %v1845_v51 }
 0x96c   :  { %v1852_v53 = vsub.f32 %v1842_v45, %v1850_v50 }
 0x96d   :  { %v1851_v54 = vsub.f32 %v1841_v46, %v1849_v52 }
 0x96e   :  { %v1854_v14 = vmul.f32 %v1852_v53, %v1852_v53 }
 0x96f   :  { %v1853_v55 = vmul.f32 %v1851_v54, %v1851_v54 }
 0x970   :  { %v1858_v56 = vsel %vm66_vm0, %v1854_v14, 0.0 }
 0x971   :  { %1859 = vadd.xlane.f32.xlu0 %v1858_v56  ;;  %v1855_v57 = vsel %vm66_vm0, %v1853_v55, 0.0 }
 0x972   :  { %1856 = vadd.xlane.f32.xlu1 %v1855_v57 }
 0x9fe   :  { %v1860_v58 = vpop.xlane.xlu0 %1859 }
 0x9ff   :  { %v1862_v59 = vmul.f32 0.03125, %v1860_v58  ;;  %v1857_v60 = vpop.xlane.xlu1 %1856 }
 0xa00   :  { %v1861_v7 = vmul.f32 0.03125, %v1857_v60 }
 0xa01   :  { %v1864_v5 = vadd.f32 1e-12, %v1862_v59 }
 0xa02   :  { %v1863_v61 = vadd.f32 1e-12, %v1861_v7 }
 0xa03   :  { %2230 = vrsqrt.f32 %v1864_v5 }
 0xa04   :  { %2232 = vrsqrt.f32 %v1863_v61 }
 0xa0d   :  { %v2231_v63 = vpop.eup %2230 }
 0xa0e   :  { %v2233_v0 = vpop.eup %2232  ;;  %v1872_v1 = vmul.f32 %v2231_v63, %v1941_v62 }
 0xa0f   :  { %v1871_v2 = vmul.f32 %v2233_v0, %v1941_v62 }
 0xa10   :  { %v1874_v4 = vmul.f32 %v1872_v1, %v1852_v53 }
 0xa11   :  { %v1873_v6 = vmul.f32 %v1871_v2, %v1851_v54 }
 0xa12   :  { %v1880_v9 = vadd.f32 %v1942_v3, %v1874_v4 }
 0xa13   :  { %v1879_v10 = vadd.f32 %v1942_v3, %v1873_v6 }
 0xa14   :  { %1882 = vst.msk [vmem:[#allocation6 + $0x8] sm:$0xff] %vm66_vm0, %v1880_v9 }
 0xa15   :  { %1881 = vst.msk [vmem:[#allocation6] sm:$0xff] %vm66_vm0, %v1879_v10 }
 0xa16   :  { %2267 = shalt.err (!%p2264_p12)
}
 0xa17   :  { %s2268_s26 = scalar_lea.hbm %s2645_s9, 256 }
 0xa18   :  { %p2269_p13 = scmp.ne.s32.totalorder %s2645_s9, %s2268_s26  ;;  %p2272_p0 = scmp.lt.u32.totalorder %s2268_s26, %s2645_s9 }
 0xa1a   :  { %p2274_p1 = pnand %p2272_p0, %p2269_p13 }
 0xa1c   :  { %2277 = shalt.err (!%p2274_p1)
}
 0xa1d   :  { %1894 = dma.vmem_to_hbm [thread:$0]  %s1889_s1, 256, %s2645_s9, [#allocation5], %s2283_s19, %s2283_s19, %s2284_s20  }
 0xa1e   :  { %2280 = dma.done.wait [#allocation5], 256  }
 0xa1f   :  { %2281 = vsyncadd [#allocation5], 4294967040 }
 0xa20   :  { %1898 = vsyncpa [#allocation4], 1 }
 0xa21   :  { %1899 = vsyncpa [#allocation5], 1 }

</bundles_post_ra>
